<compile_context>
chip_gen: v7x
topology: tpu7x:2x2x1
jax: 0.10.0
libtpu: 0.0.40
codegen_flags: <defaults>
</compile_context>

<pallas_src>
import functools

import jax
import jax.numpy as jnp
from jax.experimental import pallas as pl
from jax.experimental.pallas import tpu as pltpu


def _se_kernel(x_ref, w1t_ref, w2_ref, o_ref, *, inv_hw):
    # x_ref: (1, C, HW_pad) block for one batch element (input dtype).
    x = x_ref[0]                                   # (C, HW_pad)
    x32 = x.astype(jnp.float32)

    # --- squeeze: global average pool over spatial (lane) axis, f32 acc ----
    pooled = jnp.sum(x32, axis=-1, keepdims=True) * inv_hw        # (C, 1)

    # --- excitation on VPU/XLU (width-1 matvecs; MXU is pure latency) -------
    # h[i] = sum_c W1[i, c] * pooled[c]  with W1 passed as W1.T = (C, C//r)
    h = jnp.sum(w1t_ref[...] * pooled, axis=0, keepdims=True)     # (1, C//r)
    h = jnp.maximum(h, 0.0)
    # s[j] = sum_i W2[j, i] * h[i]       with W2 = (C, C//r)
    s = jnp.sum(w2_ref[...] * h, axis=-1, keepdims=True)          # (C, 1)

    # fold residual into the scale:  x*sigmoid(s) + x == x * (sigmoid(s) + 1)
    s1 = jax.nn.sigmoid(s) + 1.0                                  # (C, 1)

    # --- scale + residual (single multiply per element) ---------------------
    o_ref[0] = (x32 * s1).astype(o_ref.dtype)


def se_layer(x_nchw, w1, w2):
    """SE layer forward.

    x_nchw: (B, C, H, W)   activation (f32 or bf16)
    w1:     (C//r, C)      nn.Linear(C, C//r, bias=False).weight
    w2:     (C, C//r)      nn.Linear(C//r, C, bias=False).weight
    """
    B, C, H, W = x_nchw.shape
    hidden = w1.shape[0]
    HW = H * W
    HW_pad = ((HW + 127) // 128) * 128            # lane-dense output blocks

    x = x_nchw.reshape(B, C, HW)
    if HW_pad != HW:
        x = jnp.pad(x, ((0, 0), (0, 0), (0, HW_pad - HW)))

    # Pre-transpose W1 so the kernel needs no cross-lane transpose.
    w1t = jnp.transpose(w1).astype(jnp.float32)   # (C, C//r)
    w2f = w2.astype(jnp.float32)                  # (C, C//r)

    itemsize = jnp.dtype(x.dtype).itemsize
    block_bytes = C * HW_pad * itemsize
    # input + output blocks, double-buffered, plus weights and slack.
    vmem_need = 4 * block_bytes + 4 * (w1t.size + w2f.size) * 4 + (2 << 20)
    vmem_limit = int(min(max(vmem_need, 32 << 20), 96 << 20))

    cost = pl.CostEstimate(
        flops=3 * B * C * HW + 4 * B * C * hidden,
        transcendentals=B * C,
        bytes_accessed=2 * B * C * HW_pad * itemsize + (w1t.size + w2f.size) * 4,
    )

    kernel = functools.partial(_se_kernel, inv_hw=1.0 / HW)

    out = pl.pallas_call(
        kernel,
        out_shape=jax.ShapeDtypeStruct((B, C, HW_pad), x.dtype),
        grid_spec=pltpu.PrefetchScalarGridSpec(
            num_scalar_prefetch=0,
            grid=(B,),
            in_specs=[
                pl.BlockSpec((1, C, HW_pad), lambda b: (b, 0, 0)),
                pl.BlockSpec((C, hidden), lambda b: (0, 0)),
                pl.BlockSpec((C, hidden), lambda b: (0, 0)),
            ],
            out_specs=pl.BlockSpec((1, C, HW_pad), lambda b: (b, 0, 0)),
        ),
        compiler_params=pltpu.CompilerParams(
            dimension_semantics=("parallel",),
            vmem_limit_bytes=vmem_limit,
        ),
        cost_estimate=cost,
    )(x, w1t, w2f)

    if HW_pad != HW:
        out = out[:, :, :HW]
    return out.reshape(B, C, H, W)


def se_layer_ref(x, w1, w2):
    """Pure-JAX reference mirroring the PyTorch module (f32 math)."""
    x = x.astype(jnp.float32)
    y = jnp.mean(x, axis=(2, 3))                  # (B, C)
    y = jnp.maximum(y @ w1.T, 0.0)                # (B, C//r)
    y = jax.nn.sigmoid(y @ w2.T)                  # (B, C)
    y = y[:, :, None, None]
    return x * y + x


if __name__ == "__main__":
    key = jax.random.PRNGKey(0)
    kx, k1, k2, kx2 = jax.random.split(key, 4)

    # ---- main check: f32, matches PyTorch semantics exactly ---------------
    B, C, H, W = 2, 64, 16, 16
    reduction = 16
    hidden = C // reduction

    x = jax.random.normal(kx, (B, C, H, W), dtype=jnp.float32)
    w1 = jax.random.normal(k1, (hidden, C), dtype=jnp.float32) * 0.1
    w2 = jax.random.normal(k2, (C, hidden), dtype=jnp.float32) * 0.1

    out = jax.block_until_ready(se_layer(x, w1, w2))
    ref = se_layer_ref(x, w1, w2)
    assert jnp.allclose(out, ref, atol=1e-5, rtol=1e-5), "f32 mismatch vs reference"

    # ---- bf16 traffic path (dtype-preserving kernel, f32 accumulation) ----
    x_bf16 = x.astype(jnp.bfloat16)
    out_bf16 = jax.block_until_ready(se_layer(x_bf16, w1, w2))
    ref_bf16 = se_layer_ref(x_bf16.astype(jnp.float32), w1, w2)
    assert out_bf16.dtype == jnp.bfloat16
    assert jnp.allclose(out_bf16.astype(jnp.float32), ref_bf16, atol=2e-2, rtol=2e-2), \
        "bf16 mismatch vs reference"

    # ---- lane-padding path: HW = 49 (typical 7x7 SE stage) ----------------
    B2, C2, H2, W2 = 2, 32, 7, 7
    hidden2 = C2 // 8
    x2 = jax.random.normal(kx2, (B2, C2, H2, W2), dtype=jnp.float32)
    w1b = jax.random.normal(k1, (hidden2, C2), dtype=jnp.float32) * 0.1
    w2b = jax.random.normal(k2, (C2, hidden2), dtype=jnp.float32) * 0.1
    out2 = jax.block_until_ready(se_layer(x2, w1b, w2b))
    ref2 = se_layer_ref(x2, w1b, w2b)
    assert jnp.allclose(out2, ref2, atol=1e-5, rtol=1e-5), "padded-HW mismatch vs reference"

    print("KERNEL_OK")
</pallas_src>

<mosaic_0001>
module attributes {stable_mosaic.version = 11 : i64} {
  func.func @_se_kernel(%arg0: i32, %arg1: memref<1x64x256xf32, #tpu.memory_space<vmem>>, %arg2: memref<64x4xf32, #tpu.memory_space<vmem>>, %arg3: memref<64x4xf32, #tpu.memory_space<vmem>>, %arg4: memref<1x64x256xf32, #tpu.memory_space<vmem>>) attributes {dimension_semantics = [#tpu.dimension_semantics<parallel>], iteration_bounds = array<i64: 2>, scalar_prefetch = 0 : i64, scratch_operands = 0 : i64, tpu.core_type = #tpu.core_type<tc>, window_params = [{transform_indices = @transform_0, window_bounds = array<i64: 1, 64, 256>}, {pipeline_mode = #tpu.pipeline_mode<synchronous>, transform_indices = @transform_1, window_bounds = array<i64: 64, 4>}, {pipeline_mode = #tpu.pipeline_mode<synchronous>, transform_indices = @transform_2, window_bounds = array<i64: 64, 4>}, {transform_indices = @transform_3, window_bounds = array<i64: 1, 64, 256>}]} {
    %c0 = arith.constant 0 : index
    %c0_0 = arith.constant 0 : index
    %c0_1 = arith.constant 0 : index
    %0 = vector.load %arg1[%c0, %c0_0, %c0_1] : memref<1x64x256xf32, #tpu.memory_space<vmem>>, vector<1x64x256xf32>
    %1 = vector.shape_cast %0 : vector<1x64x256xf32> to vector<64x256xf32>
    %cst = arith.constant dense<0.000000e+00> : vector<64xf32>
    %2 = vector.multi_reduction <add>, %1, %cst [1] : vector<64x256xf32> to vector<64xf32>
    %3 = vector.shape_cast %2 : vector<64xf32> to vector<64x1xf32>
    %cst_2 = arith.constant 3.906250e-03 : f32
    %4 = vector.broadcast %cst_2 : f32 to vector<64x1xf32>
    %5 = arith.mulf %3, %4 : vector<64x1xf32>
    %c0_3 = arith.constant 0 : index
    %c0_4 = arith.constant 0 : index
    %6 = vector.load %arg2[%c0_3, %c0_4] : memref<64x4xf32, #tpu.memory_space<vmem>>, vector<64x4xf32>
    %7 = vector.broadcast %5 : vector<64x1xf32> to vector<64x4xf32>
    %8 = arith.mulf %6, %7 : vector<64x4xf32>
    %cst_5 = arith.constant dense<0.000000e+00> : vector<4xf32>
    %9 = vector.multi_reduction <add>, %8, %cst_5 [0] : vector<64x4xf32> to vector<4xf32>
    %10 = vector.shape_cast %9 : vector<4xf32> to vector<1x4xf32>
    %cst_6 = arith.constant 0.000000e+00 : f32
    %11 = vector.broadcast %cst_6 : f32 to vector<1x4xf32>
    %12 = arith.maximumf %10, %11 : vector<1x4xf32>
    %c0_7 = arith.constant 0 : index
    %c0_8 = arith.constant 0 : index
    %13 = vector.load %arg3[%c0_7, %c0_8] : memref<64x4xf32, #tpu.memory_space<vmem>>, vector<64x4xf32>
    %14 = vector.broadcast %12 : vector<1x4xf32> to vector<64x4xf32>
    %15 = arith.mulf %13, %14 : vector<64x4xf32>
    %cst_9 = arith.constant dense<0.000000e+00> : vector<64xf32>
    %16 = vector.multi_reduction <add>, %15, %cst_9 [1] : vector<64x4xf32> to vector<64xf32>
    %17 = vector.shape_cast %16 : vector<64xf32> to vector<64x1xf32>
    %18 = arith.negf %17 : vector<64x1xf32>
    %19 = math.exp %18 : vector<64x1xf32>
    %cst_10 = arith.constant 1.000000e+00 : f32
    %20 = vector.broadcast %cst_10 : f32 to vector<64x1xf32>
    %21 = arith.addf %20, %19 : vector<64x1xf32>
    %22 = arith.divf %20, %21 : vector<64x1xf32>
    %cst_11 = arith.constant 1.000000e+00 : f32
    %23 = vector.broadcast %cst_11 : f32 to vector<64x1xf32>
    %24 = arith.addf %22, %23 : vector<64x1xf32>
    %25 = vector.broadcast %24 : vector<64x1xf32> to vector<64x256xf32>
    %26 = arith.mulf %1, %25 : vector<64x256xf32>
    %c0_12 = arith.constant 0 : index
    %c0_13 = arith.constant 0 : index
    %c0_14 = arith.constant 0 : index
    %27 = vector.load %arg4[%c0_12, %c0_13, %c0_14] : memref<1x64x256xf32, #tpu.memory_space<vmem>>, vector<1x64x256xf32>
    %28 = vector.shape_cast %27 : vector<1x64x256xf32> to vector<64x256xf32>
    %29 = vector.shape_cast %26 : vector<64x256xf32> to vector<1x64x256xf32>
    tpu.vector_store %arg4[%c0_12, %c0_13, %c0_14], %29 {strides = array<i32>} : memref<1x64x256xf32, #tpu.memory_space<vmem>>, vector<1x64x256xf32>,
    return
  }
  func.func @transform_0(%arg0: i32) -> (i32, i32, i32) {
    %c0_i32 = arith.constant 0 : i32
    %c0_i32_0 = arith.constant 0 : i32
    %c0_i32_1 = arith.constant 0 : i32
    return %arg0, %c0_i32, %c0_i32_0 : i32, i32, i32
  }
  func.func @transform_1(%arg0: i32) -> (i32, i32) {
    %c0_i32 = arith.constant 0 : i32
    %c0_i32_0 = arith.constant 0 : i32
    %c0_i32_1 = arith.constant 0 : i32
    return %c0_i32, %c0_i32_0 : i32, i32
  }
  func.func @transform_2(%arg0: i32) -> (i32, i32) {
    %c0_i32 = arith.constant 0 : i32
    %c0_i32_0 = arith.constant 0 : i32
    %c0_i32_1 = arith.constant 0 : i32
    return %c0_i32, %c0_i32_0 : i32, i32
  }
  func.func @transform_3(%arg0: i32) -> (i32, i32, i32) {
    %c0_i32 = arith.constant 0 : i32
    %c0_i32_0 = arith.constant 0 : i32
    %c0_i32_1 = arith.constant 0 : i32
    return %arg0, %c0_i32, %c0_i32_0 : i32, i32, i32
  }
}

</mosaic_0001>

<bundles_post_ra>
// kernel: tpu_custom_call.1
= control target key start
LH: loop header
LB: loop body
LE: loop exit
PB: predicated region body
PF: predicated region fallthrough
CT: control target
= control target key end

     0   :  { %8 = vsyncpa [#allocation3], 0  ;;  %s1034_s0 = inlined_call_operand.hbm [shape: f32[2,64,256], index: 0, kind: input, shape index: {}]   ;;  %s1035_s1 = inlined_call_operand.vmem [shape: f32[64,4], index: 1, kind: input, shape index: {}]   ;;  %s1036_s2 = inlined_call_operand.vmem [shape: f32[64,4], index: 2, kind: input, shape index: {}]   ;;  %s1037_s3 = inlined_call_operand.hbm [shape: f32[2,64,256], index: 3, kind: output, shape index: {}]  }
   0x1   :  { %10 = vsyncpa [#allocation3 + $0x1], 0 }
   0x2   :  { %11 = vsyncpa [#allocation4], 0 }
   0x3   :  { %13 = vsyncpa [#allocation4 + $0x1], 0  ;;  %s721_s12 = smov 0   ;;  %s723_s13 = smov 0  }
   0x4   :  { %s725_s14 = smov 0   ;;  %s727_s15 = smov 0  }
   0x5 LB: > { %s742_s16 = sadd.s32 4294967295, %s693_s15   ;;  %s491_s17 = sadd.s32 4294967294, %s693_s15   ;;  %s693_s15 = sphi %s727_s15, %s1050_s15   ;;  %s689_s14 = sphi %s725_s14, %s1049_s14   ;;  %s685_s13 = sphi %s723_s13, %s1048_s13   ;;  %s681_s12 = sphi %s721_s12, %s1047_s12  }
   0x6   : > { %s746_s18 = sadd.s32 1, %s693_s15   ;;  %s26_s19 = sadd.s32 1, %s689_s14 }
   0x7   : > { %s23_s20 = ssub.s32 %s693_s15, %s746_s18  ;;  %p33_p0 = scmp.ne.s32.totalorder %s689_s14, %s685_s13 }
   0x8   : > { %p24_p1 = scmp.eq.s32.totalorder %s23_s20, 0  ;;  %p34_p2 = scmp.eq.s32.totalorder %s693_s15, 0 }
   0x9   : > { %p39_p3 = scmp.ne.s32.totalorder %s685_s13, %s681_s12  ;;  %p40_p4 = scmp.eq.s32.totalorder %s742_s16, 0 }
   0xa   : > { %s758_s21 = scalar_select %p24_p1, %s689_s14, %s26_s19  }
   0xb   : > { %p760_p5 = por %p34_p2, %p33_p0  ;;  %p764_p6 = por %p40_p4, %p39_p3 }
   0xc   : > { %p105_p7 = scmp.eq.s32.totalorder %s742_s16, 1  ;;  %p111_p8 = scmp.eq.s32.totalorder %s491_s17, 1 }
   0xd   : > { %p527_p10 = scmp.lt.s32.totalorder %s693_s15, 2  ;;  %s137_s26 = sand.u32 1, %s689_s14  }
   0xe   : > { %p771_p11 = por %p105_p7, %p33_p0  ;;  %p775_p12 = por %p111_p8, %p39_p3 }
   0xf   : > { %s513_s27 = sshll.u32 %s693_s15, 11  ;;  %s494_s28 = sshll.u32 %s137_s26, 7 }
  0x10   : > { %s1041_s24 = scalar_select %p771_p11, 1, 0 }
  0x11   : > { %s1042_s25 = scalar_select %p775_p12, 1, 0 }
  0x12   : > { %s784_s4 = scalar_lea.hbm %s1034_s0, %s513_s27  ;;  %s141_s5 = scalar_lea.vmem [#allocation2], %s494_s28 }
  0x13   : > { %s148_s6 = sshll.u32 %s141_s5, 4  ;;  %p788_p13 = pnand %p527_p10, %p760_p5  ;;  %s792_s6 = int_to_ptr.vmem [resolvable:$true] %s148_s6 }
  0x14   : > { %s794_s8 = scalar_lea.sflag [#allocation3], %s137_s26  ;;  %s597_s9 = scalar_lea.hbm %s784_s4, 2048 }
  0x15   : > { %p598_p0 = scmp.ne.s32.totalorder %s784_s4, %s597_s9  ;;  %p599_p1 = pneg %p788_p13 }
  0x16   : > { %s602_s17 = scalar_lea.hbm %s1034_s0, 4096  ;;  %p603_p4 = scmp.lt.u32.totalorder %s784_s4, %s1034_s0 }
  0x17   : > { %p600_p2 = pnand %p599_p1, %p598_p0  ;;  %p604_p5 = scmp.lt.u32.totalorder %s602_s17, %s597_s9 }
  0x18   : > { %p606_p8 = scmp.lt.u32.totalorder %s597_s9, %s784_s4 }
  0x19   : > { %p601_p3 = pneg %p600_p2  ;;  %p605_p7 = por %p604_p5, %p603_p4 }
  0x1b   : > { %p607_p10 = por %p606_p8, %p605_p7 }
  0x1d   : > { %p608_p9 = pnand %p607_p10, %p601_p3 }
  0x1f   : > { %611 = shalt.err (!%p608_p9)
}
  0x20   : > { %s612_s22 = scalar_lea.vmem %s792_s6, 2048  ;;  %s695_s26 = smov [#allocation2]  }
  0x21   : > { %p613_p0 = scmp.ne.s32.totalorder %s792_s6, %s612_s22  ;;  %s617_s27 = sshll.u32 %s695_s26, 4  ;;  %s618_s27 = int_to_ptr.vmem [resolvable:$false] %s617_s27 }
  0x22   : > { %s619_s28 = scalar_lea.vmem %s618_s27, 4096  ;;  %p620_p11 = scmp.lt.s32.totalorder %s792_s6, %s618_s27 }
  0x23   : > { %p615_p2 = pnand %p613_p0, %p599_p1  ;;  %p621_p4 = scmp.lt.s32.totalorder %s619_s28, %s612_s22 }
  0x25   : > { %p616_p12 = pneg %p615_p2  ;;  %p622_p5 = por %p621_p4, %p620_p11 }
  0x27   : > { %p623_p7 = pnand %p622_p5, %p616_p12 }
  0x29   : > { %626 = shalt.err (!%p623_p7)
}
  0x2a   : > { %s696_s29 = smov 256   ;;  %s697_s30 = smov 16  }
  0x2b   : > { %522 = dma.hbm_to_vmem [thread:$0]  (!%p788_p13), %s784_s4, 2048, %s792_s6, %s794_s8, %s696_s29, %s696_s29, %s697_s30  }
  0x2c   : > { %p497_p9 = scmp.ge.s32.totalorder %s693_s15, 1  ;;  %p156_p1 = scmp.lt.s32.totalorder %s693_s15, 3 }
  0x2e   : > { %p157_p3 = pnand %p497_p9, %p156_p1 }
  0x2f   : > { %s825_s5 = sand.u32 (!%p157_p3), 1, %s685_s13  }
  0x30   : > { %160 = sbr.rel (%p157_p3) target bundleno = 443 (0x1bb), region = 32  ;;  %s498_s9 = sshll.u32 (!%p157_p3), %s825_s5, 7 }
  0x31   : > { %s163_s10 = scalar_lea.sflag (!%p157_p3), [#allocation3], %s825_s5  ;;  %s166_s11 = scalar_lea.vmem (!%p157_p3), [#allocation2], %s498_s9 }
  0x37   : > { %672 = dma.done.wait (%p764_p6), %s163_s10, 2048  }
  0x38   : > { %674 = vsyncadd (%p764_p6), %s163_s10, 4294965248  ;;  %v835_v0 = vld [vmem:[%s166_s11] sm:$0xff]  ;;  %v837_v1 = vld [vmem:[%s166_s11 + $0x8] sm:$0xff]  ;;  %vm253_vm0 = vcmask 31744   ;;  %s953_s23 = scalar_lea.vmem [#allocation5], %s498_s9  ;;  %s514_s9 = sshll.u32 %s742_s16, 11 }
  0x39   : > { %v839_v2 = vld [vmem:[%s166_s11 + $0x20] sm:$0xff]  ;;  %v205_v3 = vadd.f32 %v837_v1, %v835_v0  ;;  %v843_v4 = vld [vmem:[%s166_s11 + $0x28] sm:$0xff]  ;;  %v845_v5 = vld [vmem:[%s166_s11 + $0x10] sm:$0xff]  ;;  %s418_s4 = sshll.u32 %s953_s23, 4  ;;  %s984_s8 = scalar_lea.hbm %s1037_s3, %s514_s9  ;;  %s986_s4 = int_to_ptr.vmem [resolvable:$true] %s418_s4 }
  0x3a   : > { %v847_v6 = vld [vmem:[%s166_s11 + $0x18] sm:$0xff]  ;;  %v211_v7 = vadd.f32 %v843_v4, %v839_v2  ;;  %v851_v8 = vld [vmem:[%s166_s11 + $0x30] sm:$0xff]  ;;  %v859_v12 = vld [vmem:[%s166_s11 + $0x40] sm:$0xff]  ;;  %s405_s16 = scalar_lea.sflag [#allocation4], %s825_s5  ;;  %s627_s17 = scalar_lea.vmem %s986_s4, 2048 }
  0x3b   : > { %v853_v9 = vld [vmem:[%s166_s11 + $0x38] sm:$0xff]  ;;  %206 = vadd.xlane.f32.xlu0 %v205_v3  ;;  %v208_v10 = vadd.f32 %v847_v6, %v845_v5  ;;  %v861_v13 = vld [vmem:[%s166_s11 + $0x48] sm:$0xff]  ;;  %v863_v14 = vld [vmem:[%s166_s11 + $0x50] sm:$0xff]  ;;  %p628_p6 = scmp.ne.s32.totalorder %s986_s4, %s627_s17  ;;  %p1044_p11 = scmp.ne.s32.totalorder %s1041_s24, 0 }
  0x3c   : > { %212 = vadd.xlane.f32.xlu1 %v211_v7  ;;  %v214_v11 = vadd.f32 %v853_v9, %v851_v8  ;;  %v865_v15 = vld [vmem:[%s166_s11 + $0x58] sm:$0xff]  ;;  %v217_v16 = vadd.f32 %v861_v13, %v859_v12  ;;  %v871_v18 = vld [vmem:[%s166_s11 + $0x60] sm:$0xff]  ;;  %v873_v19 = vld [vmem:[%s166_s11 + $0x68] sm:$0xff]  ;;  %s698_s19 = smov [#allocation5]  }
  0x3d   : > { %v220_v17 = vadd.f32 %v865_v15, %v863_v14  ;;  %v875_v20 = vld [vmem:[%s166_s11 + $0x70] sm:$0xff]  ;;  %v877_v21 = vld [vmem:[%s166_s11 + $0x78] sm:$0xff]  ;;  %v223_v22 = vadd.f32 %v873_v19, %v871_v18  ;;  %v237_v27 = vld [vmem:[%s1035_s1] sm:$0xff]  ;;  %p629_p12 = pnand %p628_p6, %p1044_p11  ;;  %s631_s20 = sshll.u32 %s698_s19, 4  ;;  %s632_s20 = int_to_ptr.vmem [resolvable:$false] %s631_s20 }
  0x3e   : > { %v226_v23 = vadd.f32 %v877_v21, %v875_v20  ;;  %v239_v29 = vld [vmem:[%s1035_s1 + $0x10] sm:$0xff]  ;;  %v238_v30 = vld [vmem:[%s1035_s1 + $0x8] sm:$0xff]  ;;  %v240_v34 = vld [vmem:[%s1035_s1 + $0x18] sm:$0xff]  ;;  %s633_s22 = scalar_lea.vmem %s632_s20, 4096  ;;  %p634_p8 = scmp.lt.s32.totalorder %s986_s4, %s632_s20 }
  0x3f   : > { %209 = vadd.xlane.f32.xlu0 %v208_v10  ;;  %v241_v40 = vld [vmem:[%s1035_s1 + $0x20] sm:$0xff]  ;;  %v242_v45 = vld [vmem:[%s1035_s1 + $0x28] sm:$0xff]  ;;  %v243_v54 = vld [vmem:[%s1035_s1 + $0x30] sm:$0xff]  ;;  %p630_p13 = pneg %p629_p12  ;;  %p635_p10 = scmp.lt.s32.totalorder %s633_s22, %s627_s17 }
  0x40   : > { %215 = vadd.xlane.f32.xlu1 %v214_v11  ;;  %v244_v58 = vld [vmem:[%s1035_s1 + $0x38] sm:$0xff] }
  0x41   : > { %p636_p0 = por %p635_p10, %p634_p8 }
  0x43   : > { %218 = vadd.xlane.f32.xlu0 %v217_v16  ;;  %p637_p2 = pnand %p636_p0, %p630_p13 }
  0x44   : > { %221 = vadd.xlane.f32.xlu1 %v220_v17 }
  0x47   : > { %224 = vadd.xlane.f32.xlu0 %v223_v22 }
  0x48   : > { %227 = vadd.xlane.f32.xlu1 %v226_v23 }
  0xc8   : > { %v207_v24 = vpop.xlane.xlu0 %206 }
  0xc9   : > { %v229_v25 = vmul.f32 0.00390625, %v207_v24  ;;  %v213_v26 = vpop.xlane.xlu1 %212 }
  0xca   : > { %v231_v28 = vmul.f32 0.00390625, %v213_v26 }
  0xcb   : > { %v245_v32 = vmul.f32 %v237_v27, %v229_v25 }
  0xcc   : > { %v210_v31 = vpop.xlane.xlu0 %209  ;;  %v247_v37 = vmul.f32 %v239_v29, %v231_v28  ;;  %v277_v29 = vld [vmem:[%s1036_s2 + $0x8] sm:$0xff] }
  0xcd   : > { %v230_v33 = vmul.f32 0.00390625, %v210_v31  ;;  %v216_v35 = vpop.xlane.xlu1 %215  ;;  %v254_v42 = vsel %vm253_vm0, %v245_v32, 0.0  ;;  %v279_v32 = vld [vmem:[%s1036_s2 + $0x18] sm:$0xff] }
  0xce   : > { %v232_v36 = vmul.f32 0.00390625, %v216_v35  ;;  %v257_v49 = vsel %vm253_vm0, %v247_v37, 0.0 }
  0xcf   : > { %v246_v38 = vmul.f32 %v238_v30, %v230_v33  ;;  %v276_v30 = vld [vmem:[%s1036_s2] sm:$0xff]  ;;  %v278_v33 = vld [vmem:[%s1036_s2 + $0x10] sm:$0xff] }
  0xd0   : > { %v248_v39 = vmul.f32 %v240_v34, %v232_v36  ;;  %v219_v41 = vpop.xlane.xlu0 %218 }
  0xd1   : > { %v255_v43 = vsel %vm253_vm0, %v246_v38, 0.0  ;;  %v233_v44 = vmul.f32 0.00390625, %v219_v41  ;;  %v222_v46 = vpop.xlane.xlu1 %221  ;;  %v280_v41 = vld [vmem:[%s1036_s2 + $0x20] sm:$0xff] }
  0xd2   : > { %v256_v47 = vadd.f32 %v255_v43, %v254_v42  ;;  %v234_v48 = vmul.f32 0.00390625, %v222_v46  ;;  %v259_v50 = vsel %vm253_vm0, %v248_v39, 0.0  ;;  %v283_v46 = vld [vmem:[%s1036_s2 + $0x38] sm:$0xff] }
  0xd3   : > { %v249_v51 = vmul.f32 %v241_v40, %v233_v44  ;;  %v281_v40 = vld [vmem:[%s1036_s2 + $0x28] sm:$0xff] }
  0xd4   : > { %v258_v52 = vadd.f32 %v257_v49, %v256_v47  ;;  %v250_v53 = vmul.f32 %v242_v45, %v234_v48  ;;  %v225_v55 = vpop.xlane.xlu0 %224  ;;  %v282_v47 = vld [vmem:[%s1036_s2 + $0x30] sm:$0xff] }
  0xd5   : > { %v261_v56 = vsel %vm253_vm0, %v249_v51, 0.0  ;;  %v235_v57 = vmul.f32 0.00390625, %v225_v55  ;;  %v228_v59 = vpop.xlane.xlu1 %227 }
  0xd6   : > { %v260_v60 = vadd.f32 %v259_v50, %v258_v52  ;;  %v236_v61 = vmul.f32 0.00390625, %v228_v59  ;;  %v263_v62 = vsel %vm253_vm0, %v250_v53, 0.0 }
  0xd7   : > { %v251_v63 = vmul.f32 %v243_v54, %v235_v57 }
  0xd8   : > { %v262_v3 = vadd.f32 %v261_v56, %v260_v60  ;;  %v252_v7 = vmul.f32 %v244_v58, %v236_v61 }
  0xd9   : > { %v265_v10 = vsel %vm253_vm0, %v251_v63, 0.0 }
  0xda   : > { %v264_v11 = vadd.f32 %v263_v62, %v262_v3  ;;  %v267_v16 = vsel %vm253_vm0, %v252_v7, 0.0 }
  0xdc   : > { %v266_v17 = vadd.f32 %v265_v10, %v264_v11 }
  0xde   : > { %v268_v22 = vadd.f32 %v267_v16, %v266_v17 }
  0xe0   : > { %v269_v23 = vrot.slane %v268_v22, 4 }
  0xe2   : > { %v270_v24 = vadd.f32 %v269_v23, %v268_v22 }
  0xe4   : > { %v271_v25 = vrot.slane %v270_v24, 2 }
  0xe6   : > { %v272_v26 = vadd.f32 %v271_v25, %v270_v24 }
  0xe8   : > { %v273_v27 = vrot.slane %v272_v26, 1 }
  0xea   : > { %v274_v28 = vadd.f32 %v273_v27, %v272_v26 }
  0xec   : > { %v275_v31 = vmax.f32 %v274_v28, 0.0 }
  0xee   : > { %v285_v34 = vmul.f32 %v277_v29, %v275_v31  ;;  %v284_v35 = vmul.f32 %v276_v30, %v275_v31  ;;  %v287_v38 = vmul.f32 %v279_v32, %v275_v31  ;;  %v286_v39 = vmul.f32 %v278_v33, %v275_v31 }
  0xef   : > { %v289_v44 = vmul.f32 %v281_v40, %v275_v31  ;;  %v288_v45 = vmul.f32 %v280_v41, %v275_v31  ;;  %v291_v50 = vmul.f32 %v283_v46, %v275_v31  ;;  %v290_v51 = vmul.f32 %v282_v47, %v275_v31 }
  0xf0   : > { %v295_v36 = vsel %vm253_vm0, %v285_v34, 0.0  ;;  %v292_v37 = vsel %vm253_vm0, %v284_v35, 0.0  ;;  %v301_v42 = vsel %vm253_vm0, %v287_v38, 0.0  ;;  %v298_v43 = vsel %vm253_vm0, %v286_v39, 0.0 }
  0xf1   : > { %296 = vadd.xlane.f32.xlu1 %v295_v36  ;;  %293 = vadd.xlane.f32.xlu0 %v292_v37  ;;  %v307_v48 = vsel %vm253_vm0, %v289_v44, 0.0  ;;  %v304_v49 = vsel %vm253_vm0, %v288_v45, 0.0  ;;  %v313_v52 = vsel %vm253_vm0, %v291_v50, 0.0  ;;  %v310_v53 = vsel %vm253_vm0, %v290_v51, 0.0 }
  0xf5   : > { %302 = vadd.xlane.f32.xlu1 %v301_v42  ;;  %299 = vadd.xlane.f32.xlu0 %v298_v43 }
  0xf9   : > { %308 = vadd.xlane.f32.xlu1 %v307_v48  ;;  %305 = vadd.xlane.f32.xlu0 %v304_v49 }
  0xfd   : > { %314 = vadd.xlane.f32.xlu1 %v313_v52  ;;  %311 = vadd.xlane.f32.xlu0 %v310_v53 }
 0x17e   : > { %v297_v54 = vpop.xlane.xlu1 %296  ;;  %v294_v55 = vpop.xlane.xlu0 %293 }
 0x17f   : > { %v501_v56 = vmul.f32 -1.442695, %v297_v54  ;;  %v500_v57 = vmul.f32 -1.442695, %v294_v55 }
 0x181   : > { %565 = vpow2.f32 %v501_v56 }
 0x182   : > { %567 = vpow2.f32 %v500_v57  ;;  %v303_v58 = vpop.xlane.xlu1 %302  ;;  %v300_v59 = vpop.xlane.xlu0 %299 }
 0x183   : > { %v503_v60 = vmul.f32 -1.442695, %v303_v58  ;;  %v502_v61 = vmul.f32 -1.442695, %v300_v59 }
 0x185   : > { %569 = vpow2.f32 %v503_v60 }
 0x186   : > { %571 = vpow2.f32 %v502_v61  ;;  %v309_v62 = vpop.xlane.xlu1 %308  ;;  %v306_v63 = vpop.xlane.xlu0 %305 }
 0x187   : > { %v505_v3 = vmul.f32 -1.442695, %v309_v62  ;;  %v504_v7 = vmul.f32 -1.442695, %v306_v63 }
 0x189   : > { %573 = vpow2.f32 %v505_v3 }
 0x18a   : > { %575 = vpow2.f32 %v504_v7  ;;  %v315_v10 = vpop.xlane.xlu1 %314  ;;  %v312_v11 = vpop.xlane.xlu0 %311 }
 0x18b   : > { %v566_v16 = vpop.eup %565  ;;  %v507_v17 = vmul.f32 -1.442695, %v315_v10  ;;  %v506_v24 = vmul.f32 -1.442695, %v312_v11 }
 0x18c   : > { %v568_v22 = vpop.eup %567  ;;  %v341_v23 = vadd.f32 1.0, %v566_v16 }
 0x18d   : > { %v340_v25 = vadd.f32 1.0, %v568_v22  ;;  %577 = vpow2.f32 %v507_v17 }
 0x18e   : > { %579 = vrcp.f32 %v341_v23 }
 0x18f   : > { %v570_v26 = vpop.eup %569  ;;  %581 = vrcp.f32 %v340_v25 }
 0x190   : > { %v572_v27 = vpop.eup %571  ;;  %v343_v28 = vadd.f32 1.0, %v570_v26  ;;  %583 = vpow2.f32 %v506_v24 }
 0x191   : > { %v342_v29 = vadd.f32 1.0, %v572_v27 }
 0x192   : > { %585 = vrcp.f32 %v343_v28 }
 0x193   : > { %v574_v30 = vpop.eup %573  ;;  %587 = vrcp.f32 %v342_v29 }
 0x194   : > { %v576_v31 = vpop.eup %575  ;;  %v345_v32 = vadd.f32 1.0, %v574_v30 }
 0x195   : > { %v344_v33 = vadd.f32 1.0, %v576_v31 }
 0x196   : > { %589 = vrcp.f32 %v345_v32 }
 0x197   : > { %v578_v34 = vpop.eup %577  ;;  %591 = vrcp.f32 %v344_v33 }
 0x198   : > { %v580_v35 = vpop.eup %579  ;;  %v347_v36 = vadd.f32 1.0, %v578_v34 }
 0x199   : > { %v582_v37 = vpop.eup %581  ;;  %v365_v38 = vadd.f32 1.0, %v580_v35 }
 0x19a   : > { %v584_v39 = vpop.eup %583  ;;  %v364_v40 = vadd.f32 1.0, %v582_v37  ;;  %593 = vrcp.f32 %v347_v36 }
 0x19b   : > { %v374_v41 = vmul.f32 %v365_v38, %v845_v5  ;;  %v375_v42 = vmul.f32 %v365_v38, %v847_v6  ;;  %v346_v43 = vadd.f32 1.0, %v584_v39 }
 0x19c   : > { %v586_v44 = vpop.eup %585  ;;  %v372_v45 = vmul.f32 %v364_v40, %v835_v0  ;;  %v373_v46 = vmul.f32 %v364_v40, %v837_v1 }
 0x19d   : > { %v588_v47 = vpop.eup %587  ;;  %390 = vst [vmem:[%s953_s23 + $0x10] sm:$0xff] %v374_v41  ;;  %391 = vst [vmem:[%s953_s23 + $0x18] sm:$0xff] %v375_v42  ;;  %v367_v5 = vadd.f32 1.0, %v586_v44  ;;  %595 = vrcp.f32 %v346_v43 }
 0x19e   : > { %388 = vst [vmem:[%s953_s23] sm:$0xff] %v372_v45  ;;  %389 = vst [vmem:[%s953_s23 + $0x8] sm:$0xff] %v373_v46  ;;  %v366_v0 = vadd.f32 1.0, %v588_v47 }
 0x19f   : > { %v378_v1 = vmul.f32 %v367_v5, %v851_v8  ;;  %v379_v6 = vmul.f32 %v367_v5, %v853_v9 }
 0x1a0   : > { %v590_v48 = vpop.eup %589  ;;  %v376_v49 = vmul.f32 %v366_v0, %v839_v2  ;;  %v377_v50 = vmul.f32 %v366_v0, %v843_v4 }
 0x1a1   : > { %v592_v51 = vpop.eup %591  ;;  %394 = vst [vmem:[%s953_s23 + $0x30] sm:$0xff] %v378_v1  ;;  %395 = vst [vmem:[%s953_s23 + $0x38] sm:$0xff] %v379_v6  ;;  %v369_v52 = vadd.f32 1.0, %v590_v48 }
 0x1a2   : > { %392 = vst [vmem:[%s953_s23 + $0x20] sm:$0xff] %v376_v49  ;;  %393 = vst [vmem:[%s953_s23 + $0x28] sm:$0xff] %v377_v50  ;;  %v368_v8 = vadd.f32 1.0, %v592_v51 }
 0x1a3   : > { %v382_v9 = vmul.f32 %v369_v52, %v863_v14  ;;  %v383_v53 = vmul.f32 %v369_v52, %v865_v15 }
 0x1a4   : > { %v594_v2 = vpop.eup %593  ;;  %v380_v4 = vmul.f32 %v368_v8, %v859_v12  ;;  %v381_v54 = vmul.f32 %v368_v8, %v861_v13 }
 0x1a5   : > { %398 = vst [vmem:[%s953_s23 + $0x50] sm:$0xff] %v382_v9  ;;  %399 = vst [vmem:[%s953_s23 + $0x58] sm:$0xff] %v383_v53  ;;  %v371_v55 = vadd.f32 1.0, %v594_v2 }
 0x1a6   : > { %396 = vst [vmem:[%s953_s23 + $0x40] sm:$0xff] %v380_v4  ;;  %397 = vst [vmem:[%s953_s23 + $0x48] sm:$0xff] %v381_v54 }
 0x1a7   : > { %v596_v14 = vpop.eup %595  ;;  %v386_v15 = vmul.f32 %v371_v55, %v875_v20  ;;  %v387_v56 = vmul.f32 %v371_v55, %v877_v21 }
 0x1a8   : > { %v370_v57 = vadd.f32 1.0, %v596_v14 }
 0x1a9   : > { %402 = vst [vmem:[%s953_s23 + $0x70] sm:$0xff] %v386_v15  ;;  %403 = vst [vmem:[%s953_s23 + $0x78] sm:$0xff] %v387_v56 }
 0x1aa   : > { %v384_v12 = vmul.f32 %v370_v57, %v871_v18  ;;  %v385_v13 = vmul.f32 %v370_v57, %v873_v19 }
 0x1ac   : > { %400 = vst [vmem:[%s953_s23 + $0x60] sm:$0xff] %v384_v12  ;;  %401 = vst [vmem:[%s953_s23 + $0x68] sm:$0xff] %v385_v13 }
 0x1ad   : > { %640 = shalt.err (!%p637_p2)
}
 0x1ae   : > { %s641_s26 = scalar_lea.hbm %s984_s8, 2048  ;;  %s645_s29 = scalar_lea.hbm %s1037_s3, 4096 }
 0x1af   : > { %p642_p4 = scmp.ne.s32.totalorder %s984_s8, %s641_s26  ;;  %p646_p9 = scmp.lt.u32.totalorder %s984_s8, %s1037_s3 }
 0x1b0   : > { %p647_p1 = scmp.lt.u32.totalorder %s645_s29, %s641_s26  ;;  %p649_p6 = scmp.lt.u32.totalorder %s641_s26, %s984_s8 }
 0x1b1   : > { %p643_p5 = pnand %p642_p4, %p1044_p11 }
 0x1b2   : > { %p648_p3 = por %p647_p1, %p646_p9 }
 0x1b3   : > { %p644_p7 = pneg %p643_p5 }
 0x1b4   : > { %p650_p12 = por %p649_p6, %p648_p3 }
 0x1b6   : > { %p651_p13 = pnand %p650_p12, %p644_p7 }
 0x1b8   : > { %654 = shalt.err (!%p651_p13)
}
 0x1b9   : > { %s699_s11 = smov 256   ;;  %s700_s23 = smov 16  }
 0x1ba   : > { %517 = dma.vmem_to_hbm [thread:$0]  (%p1044_p11), %s986_s4, 2048, %s984_s8, %s405_s16, %s699_s11, %s699_s11, %s700_s23  }
 0x1bb PF: > { %s433_s9 = sand.u32 1, %s681_s12   ;;  %p1045_p8 = scmp.ne.s32.totalorder %s1042_s25, 0 }
 0x1bc   : > { %p1046_p10 = scmp.ge.s32.totalorder %s693_s15, 2  ;;  %s434_s6 = scalar_lea.sflag [#allocation4], %s433_s9 }
 0x1be   : > { %p524_p0 = pnand %p1046_p10, %p1045_p8 }
 0x1c0   : > { %676 = dma.done.wait (!%p524_p0), %s434_s6, 2048  }
 0x1c1   : > { %678 = vsyncadd (!%p524_p0), %s434_s6, 4294965248  ;;  %p16_p2 = scmp.ge.s32.totalorder %s746_s18, 4   ;;  %s1047_s12 = smov %s685_s13 }
 0x1c2   : > { %s1048_s13 = smov %s689_s14  ;;  %s1049_s14 = smov %s758_s21 }
 0x1c3   : > { %s1050_s15 = smov %s746_s18  ;;  %18 = sbr.rel (!%p16_p2) target bundleno = 5 (0x5), region = 77 }
 0x1ca   :  { %439 = vsyncpa [#allocation3], 1 }
 0x1cb   :  { %441 = vsyncpa [#allocation3 + $0x1], 1 }
 0x1cc   :  { %442 = vsyncpa [#allocation4], 1 }
 0x1cd   :  { %444 = vsyncpa [#allocation4 + $0x1], 1 }

</bundles_post_ra>
